<compile_context>
chip_gen: v7x
topology: tpu7x:2x2x1
jax: 0.10.0
libtpu: 0.0.40
codegen_flags: <defaults>
</compile_context>

<pallas_src>
import functools

import jax
import jax.numpy as jnp
import numpy as np
from jax.experimental import pallas as pl
from jax.experimental.pallas import tpu as pltpu


def _round_up(x, m):
    return ((x + m - 1) // m) * m


def _channel_attention_kernel(x_ref, wfc_ref, w1_ref, w2_ref, o_ref, acc_ref,
                              *, inv_hw):
    # x_ref  : (TB, C, T_HW)  spatial tile of TB batch elements (zero-padded tail)
    # wfc_ref: (C, 60)        fc  weight, pre-transposed (row-major MLP)
    # w1_ref : (60, MID)      fc1 weight, pre-transposed
    # w2_ref : (MID, C)       fc2 weight, pre-transposed
    # o_ref  : (TB, C)        lane-dense attention output
    # acc_ref: (TB, C) f32    running spatial sum (scratch, persists over grid)
    s = pl.program_id(1)

    @pl.when(s == 0)
    def _():
        acc_ref[...] = jnp.zeros_like(acc_ref)

    # Pool-first: accumulate the spatial sum in f32 (VPU/XLU lane reduction,
    # HBM-bandwidth bound).  Zero padding of the tail keeps the sum exact.
    x = x_ref[...].astype(jnp.float32)                       # (TB, C, T_HW)
    acc_ref[...] += jnp.sum(x, axis=-1)                      # (TB, C)

    @pl.when(s == pl.num_programs(1) - 1)
    def _():
        avg = acc_ref[...] * inv_hw                          # mean over true H*W
        # fc (1x1 conv) applied to the pooled vector, then the tiny MLP —
        # all in lane-major (TB, N) row layout.
        y = jnp.dot(avg, wfc_ref[...],
                    preferred_element_type=jnp.float32)      # (TB, 60)
        h = jnp.dot(y, w1_ref[...],
                    preferred_element_type=jnp.float32)      # (TB, MID)
        h = jnp.maximum(h, 0.0)
        o = jnp.dot(h, w2_ref[...],
                    preferred_element_type=jnp.float32)      # (TB, C)
        o_ref[...] = jax.nn.sigmoid(o).astype(o_ref.dtype)


def channel_attention(x, w_fc, w_fc1, w_fc2, *, x_dtype=None,
                      max_spatial_tile=16384):
    """x: (B, C_in, H, W) NCHW. Returns (B, C_in, 1, 1) like the torch module.

    x_dtype: optionally cast x (e.g. jnp.bfloat16) at the boundary to halve HBM
    traffic; the kernel always accumulates the spatial sum in f32.
    """
    B, C, H, W = x.shape
    HW = H * W
    hidden = w_fc.shape[0]   # 60
    mid = w_fc1.shape[0]     # 60 // ratio

    # Spatial tile (lane axis): multiple of 128, capped so double-buffered
    # input blocks stay small (v7x has only 64 MiB VMEM).
    t_hw = min(_round_up(HW, 128), max_spatial_tile)
    hw_pad = _round_up(HW, t_hw)

    # Batch tile: fills sublanes / amortizes per-grid-step overhead.
    tb = B if B <= 8 else 8
    b_pad = _round_up(B, tb)

    x_flat = x.reshape(B, C, HW)
    if x_dtype is not None:
        x_flat = x_flat.astype(x_dtype)
    if hw_pad != HW or b_pad != B:
        x_flat = jnp.pad(x_flat, ((0, b_pad - B), (0, 0), (0, hw_pad - HW)))

    # Pre-transpose the (tiny) weights once so the MLP runs on lane-major rows.
    wfc_t = jnp.asarray(w_fc, jnp.float32).T      # (C, 60)
    w1_t = jnp.asarray(w_fc1, jnp.float32).T      # (60, MID)
    w2_t = jnp.asarray(w_fc2, jnp.float32).T      # (MID, C)

    kernel = functools.partial(_channel_attention_kernel, inv_hw=1.0 / float(HW))

    out = pl.pallas_call(
        kernel,
        out_shape=jax.ShapeDtypeStruct((b_pad, C), jnp.float32),
        grid_spec=pltpu.PrefetchScalarGridSpec(
            num_scalar_prefetch=0,
            grid=(b_pad // tb, hw_pad // t_hw),
            in_specs=[
                pl.BlockSpec((tb, C, t_hw), lambda b, s: (b, 0, s)),
                pl.BlockSpec((C, hidden), lambda b, s: (0, 0)),
                pl.BlockSpec((hidden, mid), lambda b, s: (0, 0)),
                pl.BlockSpec((mid, C), lambda b, s: (0, 0)),
            ],
            out_specs=pl.BlockSpec((tb, C), lambda b, s: (b, 0)),
            scratch_shapes=[pltpu.VMEM((tb, C), jnp.float32)],
        ),
        compiler_params=pltpu.CompilerParams(
            dimension_semantics=("parallel", "arbitrary"),
            vmem_limit_bytes=32 * 1024 * 1024,
        ),
    )(x_flat, wfc_t, w1_t, w2_t)

    return out[:B].reshape(B, C, 1, 1)


def channel_attention_ref(x, w_fc, w_fc1, w_fc2):
    """Pure-JAX reference mirroring the PyTorch forward exactly."""
    y = jnp.einsum("oc,bchw->bohw", w_fc, x)                 # fc (1x1 conv)
    a = jnp.mean(y, axis=(2, 3), keepdims=True)              # avg_pool -> (B,60,1,1)
    h = jnp.maximum(jnp.einsum("oc,bchw->bohw", w_fc1, a), 0.0)   # fc1 + relu
    o = jnp.einsum("oc,bchw->bohw", w_fc2, h)                # fc2
    return jax.nn.sigmoid(o)                                 # (B, C, 1, 1)


if __name__ == "__main__":
    in_planes = 4
    ratio = 15
    hidden = 60
    mid = hidden // ratio   # 4
    B, H, W = 2, 16, 16

    key = jax.random.PRNGKey(0)
    kx, k1, k2, k3 = jax.random.split(key, 4)

    x = jax.random.normal(kx, (B, in_planes, H, W), dtype=jnp.float32)

    # Deterministic synthetic 1x1-conv weights (squeezed to 2D), fan-in scaled.
    w_fc = jax.random.normal(k1, (hidden, in_planes), jnp.float32) * (1.0 / np.sqrt(in_planes))
    w_fc1 = jax.random.normal(k2, (mid, hidden), jnp.float32) * (1.0 / np.sqrt(hidden))
    w_fc2 = jax.random.normal(k3, (in_planes, mid), jnp.float32) * (1.0 / np.sqrt(mid))

    ref = jax.block_until_ready(channel_attention_ref(x, w_fc, w_fc1, w_fc2))

    # f32 path: must match the reference tightly.
    out = jax.block_until_ready(channel_attention(x, w_fc, w_fc1, w_fc2))
    assert out.shape == (B, in_planes, 1, 1), out.shape
    np.testing.assert_allclose(np.asarray(out), np.asarray(ref), rtol=1e-5, atol=1e-5)

    # bf16-input path (halves HBM traffic on v6e/v7x); f32 accumulation inside.
    out_bf16 = jax.block_until_ready(
        channel_attention(x, w_fc, w_fc1, w_fc2, x_dtype=jnp.bfloat16))
    np.testing.assert_allclose(np.asarray(out_bf16), np.asarray(ref), rtol=2e-2, atol=2e-2)

    print("KERNEL_OK")
</pallas_src>

<mosaic_0001>
module attributes {stable_mosaic.version = 11 : i64} {
  func.func @_channel_attention_kernel(%arg0: i32, %arg1: i32, %arg2: memref<2x4x256xf32, #tpu.memory_space<vmem>>, %arg3: memref<4x60xf32, #tpu.memory_space<vmem>>, %arg4: memref<60x4xf32, #tpu.memory_space<vmem>>, %arg5: memref<4x4xf32, #tpu.memory_space<vmem>>, %arg6: memref<2x4xf32, #tpu.memory_space<vmem>>, %arg7: memref<2x4xf32, #tpu.memory_space<vmem>>) attributes {dimension_semantics = [#tpu.dimension_semantics<parallel>, #tpu.dimension_semantics<arbitrary>], iteration_bounds = array<i64: 1, 1>, scalar_prefetch = 0 : i64, scratch_operands = 1 : i64, tpu.core_type = #tpu.core_type<tc>, window_params = [{transform_indices = @transform_0, window_bounds = array<i64: 2, 4, 256>}, {pipeline_mode = #tpu.pipeline_mode<synchronous>, transform_indices = @transform_1, window_bounds = array<i64: 4, 60>}, {pipeline_mode = #tpu.pipeline_mode<synchronous>, transform_indices = @transform_2, window_bounds = array<i64: 60, 4>}, {pipeline_mode = #tpu.pipeline_mode<synchronous>, transform_indices = @transform_3, window_bounds = array<i64: 4, 4>}, {transform_indices = @transform_4, window_bounds = array<i64: 2, 4>}]} {
    %c0_i32 = arith.constant 0 : i32
    %0 = arith.cmpi eq, %arg1, %c0_i32 : i32
    %1 = arith.extui %0 : i1 to i32
    %c0_i32_0 = arith.constant 0 : i32
    %2 = arith.cmpi ne, %1, %c0_i32_0 : i32
    scf.if %2 {
      %cst_9 = arith.constant 0.000000e+00 : f32
      %11 = vector.broadcast %cst_9 : f32 to vector<2x4xf32>
      %c0_10 = arith.constant 0 : index
      %c0_11 = arith.constant 0 : index
      %12 = vector.load %arg7[%c0_10, %c0_11] : memref<2x4xf32, #tpu.memory_space<vmem>>, vector<2x4xf32>
      tpu.vector_store %arg7[%c0_10, %c0_11], %11 {strides = array<i32>} : memref<2x4xf32, #tpu.memory_space<vmem>>, vector<2x4xf32>,
    } else {
    }
    %c0 = arith.constant 0 : index
    %c0_1 = arith.constant 0 : index
    %c0_2 = arith.constant 0 : index
    %3 = vector.load %arg2[%c0, %c0_1, %c0_2] : memref<2x4x256xf32, #tpu.memory_space<vmem>>, vector<2x4x256xf32>
    %c0_3 = arith.constant 0 : index
    %c0_4 = arith.constant 0 : index
    %4 = vector.load %arg7[%c0_3, %c0_4] : memref<2x4xf32, #tpu.memory_space<vmem>>, vector<2x4xf32>
    %cst = arith.constant dense<0.000000e+00> : vector<2x4xf32>
    %5 = vector.multi_reduction <add>, %3, %cst [2] : vector<2x4x256xf32> to vector<2x4xf32>
    %6 = arith.addf %4, %5 : vector<2x4xf32>
    %c0_5 = arith.constant 0 : index
    %c0_6 = arith.constant 0 : index
    %7 = vector.load %arg7[%c0_5, %c0_6] : memref<2x4xf32, #tpu.memory_space<vmem>>, vector<2x4xf32>
    tpu.vector_store %arg7[%c0_5, %c0_6], %6 {strides = array<i32>} : memref<2x4xf32, #tpu.memory_space<vmem>>, vector<2x4xf32>,
    %c0_i32_7 = arith.constant 0 : i32
    %8 = arith.cmpi eq, %arg1, %c0_i32_7 : i32
    %9 = arith.extui %8 : i1 to i32
    %c0_i32_8 = arith.constant 0 : i32
    %10 = arith.cmpi ne, %9, %c0_i32_8 : i32
    scf.if %10 {
      %c0_9 = arith.constant 0 : index
      %c0_10 = arith.constant 0 : index
      %11 = vector.load %arg7[%c0_9, %c0_10] : memref<2x4xf32, #tpu.memory_space<vmem>>, vector<2x4xf32>
      %cst_11 = arith.constant 3.906250e-03 : f32
      %12 = vector.broadcast %cst_11 : f32 to vector<2x4xf32>
      %13 = arith.mulf %11, %12 : vector<2x4xf32>
      %c0_12 = arith.constant 0 : index
      %c0_13 = arith.constant 0 : index
      %14 = vector.load %arg3[%c0_12, %c0_13] : memref<4x60xf32, #tpu.memory_space<vmem>>, vector<4x60xf32>
      %cst_14 = arith.constant dense<0.000000e+00> : vector<2x60xf32>
      %15 = tpu.matmul %13, %14, %cst_14 {dimension_numbers = #tpu.dot_dimension_numbers<[1], [0], [0], [1], [0, 0, 1, 1], [], []>} : vector<2x4xf32>, vector<4x60xf32>, vector<2x60xf32> -> vector<2x60xf32>
      %c0_15 = arith.constant 0 : index
      %c0_16 = arith.constant 0 : index
      %16 = vector.load %arg4[%c0_15, %c0_16] : memref<60x4xf32, #tpu.memory_space<vmem>>, vector<60x4xf32>
      %cst_17 = arith.constant dense<0.000000e+00> : vector<2x4xf32>
      %17 = tpu.matmul %15, %16, %cst_17 {dimension_numbers = #tpu.dot_dimension_numbers<[1], [0], [0], [1], [0, 0, 1, 1], [], []>} : vector<2x60xf32>, vector<60x4xf32>, vector<2x4xf32> -> vector<2x4xf32>
      %cst_18 = arith.constant 0.000000e+00 : f32
      %18 = vector.broadcast %cst_18 : f32 to vector<2x4xf32>
      %19 = arith.maximumf %17, %18 : vector<2x4xf32>
      %c0_19 = arith.constant 0 : index
      %c0_20 = arith.constant 0 : index
      %20 = vector.load %arg5[%c0_19, %c0_20] : memref<4x4xf32, #tpu.memory_space<vmem>>, vector<4x4xf32>
      %cst_21 = arith.constant dense<0.000000e+00> : vector<2x4xf32>
      %21 = tpu.matmul %19, %20, %cst_21 {dimension_numbers = #tpu.dot_dimension_numbers<[1], [0], [0], [1], [0, 0, 1, 1], [], []>} : vector<2x4xf32>, vector<4x4xf32>, vector<2x4xf32> -> vector<2x4xf32>
      %22 = arith.negf %21 : vector<2x4xf32>
      %23 = math.exp %22 : vector<2x4xf32>
      %cst_22 = arith.constant 1.000000e+00 : f32
      %24 = vector.broadcast %cst_22 : f32 to vector<2x4xf32>
      %25 = arith.addf %24, %23 : vector<2x4xf32>
      %26 = arith.divf %24, %25 : vector<2x4xf32>
      %c0_23 = arith.constant 0 : index
      %c0_24 = arith.constant 0 : index
      %27 = vector.load %arg6[%c0_23, %c0_24] : memref<2x4xf32, #tpu.memory_space<vmem>>, vector<2x4xf32>
      tpu.vector_store %arg6[%c0_23, %c0_24], %26 {strides = array<i32>} : memref<2x4xf32, #tpu.memory_space<vmem>>, vector<2x4xf32>,
    } else {
    }
    return
  }
  func.func @transform_0(%arg0: i32, %arg1: i32) -> (i32, i32, i32) {
    %c0_i32 = arith.constant 0 : i32
    %c0_i32_0 = arith.constant 0 : i32
    return %arg0, %c0_i32, %arg1 : i32, i32, i32
  }
  func.func @transform_1(%arg0: i32, %arg1: i32) -> (i32, i32) {
    %c0_i32 = arith.constant 0 : i32
    %c0_i32_0 = arith.constant 0 : i32
    %c0_i32_1 = arith.constant 0 : i32
    return %c0_i32, %c0_i32_0 : i32, i32
  }
  func.func @transform_2(%arg0: i32, %arg1: i32) -> (i32, i32) {
    %c0_i32 = arith.constant 0 : i32
    %c0_i32_0 = arith.constant 0 : i32
    %c0_i32_1 = arith.constant 0 : i32
    return %c0_i32, %c0_i32_0 : i32, i32
  }
  func.func @transform_3(%arg0: i32, %arg1: i32) -> (i32, i32) {
    %c0_i32 = arith.constant 0 : i32
    %c0_i32_0 = arith.constant 0 : i32
    %c0_i32_1 = arith.constant 0 : i32
    return %c0_i32, %c0_i32_0 : i32, i32
  }
  func.func @transform_4(%arg0: i32, %arg1: i32) -> (i32, i32) {
    %c0_i32 = arith.constant 0 : i32
    %c0_i32_0 = arith.constant 0 : i32
    return %arg0, %c0_i32 : i32, i32
  }
}

</mosaic_0001>

<bundles_post_ra>
// kernel: tpu_custom_call.1
= control target key start
LH: loop header
LB: loop body
LE: loop exit
PB: predicated region body
PF: predicated region fallthrough
CT: control target
= control target key end

     0   :  { %vm33_vm0 = vcmask 1043456   ;;  %s517_s0 = inlined_call_operand.vmem [shape: f32[2,4,256], index: 0, kind: input, shape index: {}]   ;;  %s518_s1 = inlined_call_operand.vmem [shape: f32[4,60], index: 1, kind: input, shape index: {}]   ;;  %s519_s2 = inlined_call_operand.vmem [shape: f32[60,4], index: 2, kind: input, shape index: {}]   ;;  %s520_s3 = inlined_call_operand.vmem [shape: f32[4,4], index: 3, kind: input, shape index: {}]   ;;  %s521_s4 = inlined_call_operand.hbm [shape: f32[2,4], index: 4, kind: output, shape index: {}]  }
   0x1   :  { %v24_v0 = vld [vmem:[%s517_s0] sm:$0xff]  ;;  %v25_v1 = vld [vmem:[%s517_s0 + $0x8] sm:$0xff] }
   0x2   :  { %9 = vsyncpa [#allocation4], 0  ;;  %v29_v2 = vcombine.high %v24_v0, %v24_v0  ;;  %v34_v3 = vsel %vm33_vm0, %v24_v0, 0.0  ;;  %v30_v4 = vcombine.high %v25_v1, %v25_v1  ;;  %v39_v6 = vsel %vm33_vm0, %v25_v1, 0.0  ;;  %v67_v11 = vld [vmem:[%s518_s1] sm:$0xf] }
   0x3   :  { %vm22_vm1 = vcmask 25600   ;;  %v426_v10 = vmov 0.0   ;;  %vm427_vm2 = vmmov 0   ;;  %v145_v12 = vld [vmem:[%s519_s2] sm:$0xff]  ;;  %v146_v13 = vld [vmem:[%s519_s2 + $0x8] sm:$0xff]  ;;  %v147_v14 = vld [vmem:[%s519_s2 + $0x10] sm:$0xff]  ;;  %v46_v25 = vlaneseq }
   0x4   :  { %v35_v5 = vsel %vm33_vm0, %v29_v2, 0.0  ;;  %v40_v7 = vsel %vm33_vm0, %v30_v4, 0.0  ;;  %23 = vst.msk [vmem:[#allocation2] sm:$0x3] %vm22_vm1, %v426_v10  ;;  %349 = vmatprep.subr.mxu0 %v426_v10  ;;  %351 = vmatprep.mubr.msk.f32.mxu0 %vm427_vm2, %v426_v10  ;;  %v428_v15 = vmov 0.0|0.0   ;;  %v379_v16 = vpack.c.bf16 %v146_v13, %v145_v12  ;;  %v148_v17 = vld [vmem:[%s519_s2 + $0x18] sm:$0xff] }
   0x5   :  { %v36_v8 = vadd.f32 %v35_v5, %v34_v3  ;;  %v41_v9 = vadd.f32 %v40_v7, %v39_v6  ;;  %350 = vmatpush3.msk.msra.mxu0 %vm33_vm0, %v67_v11  ;;  %370 = vmatprep.mubr.msk.f32.mxu1 %vm427_vm2, %v426_v10  ;;  %v382_v18 = vpack.c.bf16 %v148_v17, %v147_v14  ;;  %v149_v19 = vld [vmem:[%s519_s2 + $0x20] sm:$0xff]  ;;  %v150_v20 = vld [vmem:[%s519_s2 + $0x28] sm:$0xff]  ;;  %v151_v22 = vld [vmem:[%s519_s2 + $0x30] sm:$0xff]  ;;  %vm429_vm3 = vmmov 1   ;;  %s430_s10 = smov [#allocation3]  }
   0x6   :  { %373 = vmatprep.subr.mxu0 %v426_v10  ;;  %378 = vmatprep.subr.bf16.mxu1 %v428_v15  ;;  %v385_v21 = vpack.c.bf16 %v150_v20, %v149_v19  ;;  %v152_v23 = vld [vmem:[%s519_s2 + $0x38] sm:$0xf]  ;;  %vm389_vm4 = vmpackc.low %vm33_vm0, %vm429_vm3  ;;  %v47_v26 = vand.u32 127, %v46_v25  ;;  %v49_v27 = vshrl.u32 %v46_v25, 7  ;;  %vm56_vm5 = vcmask 1041409   ;;  %s321_s11 = sshll.u32 %s430_s10, 4  ;;  %s322_s11 = int_to_ptr.vmem [resolvable:$true] %s321_s11 }
   0x7   :  { %37 = vadd.xlane.f32.xlu0 %v36_v8  ;;  %380 = vmatpush3.bf16.msra.mxu1 %v379_v16  ;;  %v388_v24 = vpack.c.bf16 %v152_v23, %v151_v22  ;;  %vm68_vm6 = vcmask 31744   ;;  %v231_v38 = vld [vmem:[%s520_s3] sm:$0xf]  ;;  %vm153_vm7 = vcmask 490496   ;;  %s402_s3 = scalar_lea.vmem %s322_s11, 32  ;;  %p407_p1 = scmp.lt.s32.totalorder %s322_s11, %s322_s11 }
   0x8   :  { %381 = vmatprep.subr.bf16.mxu1 %v428_v15  ;;  %v50_v29 = vsub.s32 %v47_v26, %v49_v27  ;;  %p403_p0 = scmp.ne.s32.totalorder %s322_s11, %s402_s3  ;;  %p408_p2 = scmp.lt.s32.totalorder %s402_s3, %s402_s3 }
   0xa   :  { %p409_p3 = por %p408_p2, %p407_p1 }
   0xb   :  { %42 = vadd.xlane.f32.xlu0 %v41_v9  ;;  %383 = vmatpush3.bf16.msra.mxu1 %v382_v18  ;;  %v26_v32 = vld [vmem:[#allocation2] sm:$0x3] }
   0xc   :  { %384 = vmatprep.subr.bf16.mxu1 %v428_v15  ;;  %p410_p4 = pnand %p409_p3, %p403_p0 }
   0xf   :  { %386 = vmatpush3.bf16.msra.mxu1 %v385_v21 }
  0x10   :  { %387 = vmatprep.subr.bf16.mxu1 %v428_v15 }
  0x13   :  { %390 = vmatpush3.bf16.msk.msra.mxu1 %vm389_vm4, %v388_v24 }
  0x94   :  { %v38_v28 = vpop.xlane.xlu0 %37 }
  0x95   :  { %v51_v31 = vrot.slane %v38_v28, %v50_v29 }
  0x98   :  { %v43_v30 = vpop.xlane.xlu0 %42 }
  0x99   :  { %v55_v33 = vrot.slane %v43_v30, %v50_v29 }
  0x9b   :  { %v57_v34 = vsel %vm56_vm5, %v55_v33, %v51_v31 }
  0x9c   :  { %v59_v35 = vadd.f32 %v57_v34, %v26_v32 }
  0x9e   :  { %61 = vst.msk [vmem:[#allocation2] sm:$0x3] %vm22_vm1, %v59_v35 }
  0xa5   :  { %v65_v36 = vld [vmem:[#allocation2] sm:$0x3] }
  0xa6   :  { %v66_v37 = vmul.f32 0.00390625, %v65_v36 }
  0xa8   :  { %352 = vmatmul.mubr.msk.f32.vlgmr.msra.gmra.mrb[0].mxu0 %vm68_vm6, %v66_v37 }
  0xa9   :  { %375 = vmatprep.mubr.msk.f32.mxu0 %vm427_vm2, %v426_v10  ;;  %374 = vmatpush3.msk.msra.mxu0 %vm33_vm0, %v231_v38 }
 0x17b   :  { %v141_v39 = vpop.f32.mrb[0].mxu0 }
 0x17c   :  { %v353_v40 = vpop.f32.mrb[1].mxu0  ;;  %371 = vmatmul.mubr.msk.f32.vlgmr.msra.gmra.mrb[0].mxu1 %vm153_vm7, %v141_v39 }
 0x24f   :  { %v226_v41 = vpop.f32.mrb[0].mxu1 }
 0x250   :  { %v230_v42 = vmax.f32 %v226_v41, 0.0  ;;  %v372_v43 = vpop.f32.mrb[1].mxu1 }
 0x252   :  { %376 = vmatmul.mubr.msk.f32.vlgmr.msra.gmra.mrb[2].mxu0 %vm68_vm6, %v230_v42 }
 0x325   :  { %v304_v44 = vpop.f32.mrb[2].mxu0 }
 0x326   :  { %v335_v45 = vmul.f32 -1.442695, %v304_v44  ;;  %v377_v46 = vpop.f32.mrb[3].mxu0 }
 0x328   :  { %398 = vpow2.f32 %v335_v45 }
 0x332   :  { %v399_v47 = vpop.eup %398 }
 0x333   :  { %v311_v48 = vadd.f32 1.0, %v399_v47 }
 0x335   :  { %400 = vrcp.f32 %v311_v48 }
 0x33f   :  { %v401_v49 = vpop.eup %400 }
 0x340   :  { %314 = vst.msk [vmem:[#allocation3] sm:$0x3] %vm22_vm1, %v401_v49 }
 0x341   :  { %413 = shalt.err (!%p410_p4)
}
 0x342   :  { %s414_s14 = scalar_lea.hbm %s521_s4, 32 }
 0x343   :  { %p415_p5 = scmp.ne.s32.totalorder %s521_s4, %s414_s14  ;;  %p418_p6 = scmp.lt.u32.totalorder %s414_s14, %s521_s4 }
 0x345   :  { %p420_p7 = pnand %p418_p6, %p415_p5 }
 0x347   :  { %423 = shalt.err (!%p420_p7)
}
 0x348   :  { %324 = dma.vmem_to_hbm [thread:$0]  %s322_s11, 32, %s521_s4, [#allocation4]  }
 0x349   :  { %424 = dma.done.wait [#allocation4], 32  }
 0x34a   :  { %425 = vsyncadd [#allocation4], 4294967264 }
 0x34b   :  { %328 = vsyncpa [#allocation4], 1 }

</bundles_post_ra>
